<compile_context>
chip_gen: v7x
topology: tpu7x:2x2x1
jax: 0.10.0
libtpu: 0.0.40
codegen_flags: <defaults>
</compile_context>

<pallas_src>
import functools

import jax
import jax.numpy as jnp
from jax.experimental import pallas as pl
from jax.experimental.pallas import tpu as pltpu


# --------------------------------------------------------------------------- #
# Helpers
# --------------------------------------------------------------------------- #
def _round_up(x, m):
    return (x + m - 1) // m * m


def _vmem_limit_bytes():
    """Generation-aware VMEM limit: ~3/4 of physical, capped at 96 MiB
    (v7x: 64 MiB physical -> 48 MiB; v5e/v6e: 128 MiB -> 96 MiB)."""
    cap = 128 * 1024 * 1024
    try:
        cap = int(pltpu.get_tpu_info().vmem_capacity_bytes)
    except Exception:
        pass
    return int(min(96 * 1024 * 1024, (cap * 3) // 4))


def _pick_block_batch(*, d_in, H, O, dim_out, in_itemsize, out_itemsize,
                      act_itemsize, weight_bytes, vmem_limit, n_buf=3):
    """Largest batch tile whose buffered I/O tiles + weights + in-kernel
    intermediates fit the generation-aware VMEM limit."""
    # Weights counted double-buffered (worst case if Buffered(1) falls back),
    # plus headroom for compiler-internal scratch.
    budget = max(vmem_limit - 2 * weight_bytes - (8 << 20), 4 << 20)
    per_row = n_buf * (d_in * in_itemsize + dim_out * out_itemsize)   # streamed I/O buffers
    per_row += d_in * (in_itemsize + act_itemsize)                    # concat + cast copies
    per_row += H * (4 + act_itemsize)                                 # f32 hidden + cast copy
    per_row += O * 4                                                  # f32 pre-sigmoid
    tb = budget // max(per_row, 1)
    return max(8, min(8192, (tb // 8) * 8))


# --------------------------------------------------------------------------- #
# Kernels
# --------------------------------------------------------------------------- #
def _gnu_kernel_general(fd_ref, fg_ref, w1_ref, b1_ref, w2_ref, b2_ref, o_ref,
                        *, gamma, dim_out):
    cd = w1_ref.dtype
    # Fused torch.cat + in-kernel cast to the compute dtype (no HBM cast pass),
    # then a single W1 matmul over the concatenated features.
    x = jnp.concatenate([fd_ref[...], fg_ref[...]], axis=-1).astype(cd)
    h = jnp.dot(x, w1_ref[...], preferred_element_type=jnp.float32)
    h = jnp.maximum(h + b1_ref[...], 0.0)                       # bias + ReLU in f32
    y = jnp.dot(h.astype(cd), w2_ref[...], preferred_element_type=jnp.float32)
    y = y[:, :dim_out] + b2_ref[...]                            # drop lane padding pre-store
    o_ref[...] = (gamma * jax.nn.sigmoid(y)).astype(o_ref.dtype)


def _gnu_kernel_domain_only(fd_ref, w1_ref, b1_ref, w2_ref, b2_ref, o_ref,
                            *, gamma, dim_out):
    cd = w1_ref.dtype
    x = fd_ref[...].astype(cd)
    h = jnp.dot(x, w1_ref[...], preferred_element_type=jnp.float32)
    h = jnp.maximum(h + b1_ref[...], 0.0)
    y = jnp.dot(h.astype(cd), w2_ref[...], preferred_element_type=jnp.float32)
    y = y[:, :dim_out] + b2_ref[...]
    o_ref[...] = (gamma * jax.nn.sigmoid(y)).astype(o_ref.dtype)


# --------------------------------------------------------------------------- #
# Parameter preparation (one-time): pad hidden/output dims for the MXU, cast.
# --------------------------------------------------------------------------- #
def prepare_params(params, *, compute_dtype=jnp.bfloat16):
    """Pad hidden (and W2's output columns) to multiples of 128 for lane-dense
    MXU operands; cast matmul operands to `compute_dtype` (biases stay f32).
    Padded hidden units have zero weights/bias and zero W2 rows -> no effect;
    padded W2 output columns are sliced off inside the kernel before the store."""
    w1, b1, w2, b2 = params
    dim_in, dim_hidden = w1.shape
    dim_out = w2.shape[1]

    H = _round_up(dim_hidden, 128)
    O = _round_up(dim_out, 128)

    w1p = jnp.pad(w1, ((0, 0), (0, H - dim_hidden))).astype(compute_dtype)
    b1p = jnp.pad(b1.reshape(1, -1), ((0, 0), (0, H - dim_hidden))).astype(jnp.float32)
    w2p = jnp.pad(w2, ((0, H - dim_hidden), (0, O - dim_out))).astype(compute_dtype)
    b2p = b2.reshape(1, -1).astype(jnp.float32)   # unpadded: added after the slice

    return {"w1": w1p, "b1": b1p, "w2": w2p, "b2": b2p,
            "dim_in": dim_in, "dim_out": dim_out}


# --------------------------------------------------------------------------- #
# Wrapper
# --------------------------------------------------------------------------- #
def gate_neural_unit(f_domain, prepared, f_general=None, *, gamma=2.0,
                     out_dtype=None, block_batch=None):
    """JAX wrapper reproducing GateNeuralUnit.forward (forward pass only).

    `prepared` comes from `prepare_params`.  When f_general is given, the
    PyTorch `.detach()` is mapped to stop_gradient.  `out_dtype` defaults to
    f_domain.dtype; pass jnp.bfloat16 to halve output writeback bytes.
    """
    # TODO(synk): forward-only — a custom_vjp / backward kernel is required before
    # jax.grad can flow through this pallas_call (the stop_gradient on f_general
    # only matters under autodiff).
    w1, b1, w2, b2 = prepared["w1"], prepared["b1"], prepared["w2"], prepared["b2"]
    dim_out = prepared["dim_out"]
    if out_dtype is None:
        out_dtype = f_domain.dtype

    B, d_dom = f_domain.shape
    H, O = w2.shape

    has_general = f_general is not None
    if has_general:
        fg = jax.lax.stop_gradient(f_general)            # .detach(); no dtype cast here
        d_gen = fg.shape[1]
    else:
        fg = None
        d_gen = 0
    assert d_dom + d_gen == prepared["dim_in"], "feature dims do not match params"

    compute_dtype = w1.dtype
    vmem_limit = _vmem_limit_bytes()
    weight_bytes = sum(int(a.nbytes) for a in (w1, b1, w2, b2))

    tb = block_batch or _pick_block_batch(
        d_in=d_dom + d_gen, H=H, O=O, dim_out=dim_out,
        in_itemsize=jnp.dtype(f_domain.dtype).itemsize,
        out_itemsize=jnp.dtype(out_dtype).itemsize,
        act_itemsize=jnp.dtype(compute_dtype).itemsize,
        weight_bytes=weight_bytes, vmem_limit=vmem_limit)
    tb = min(_round_up(tb, 8), _round_up(B, 8))
    # Keep >= 2 grid steps on the "parallel" batch axis so v7x megacore can shard it.
    tb = min(tb, max(8, _round_up((B + 1) // 2, 8)))
    grid = (pl.cdiv(B, tb),)

    flops = 2 * B * (d_dom + d_gen) * H + 2 * B * H * O
    cost = pl.CostEstimate(
        flops=flops, transcendentals=B * dim_out,
        bytes_accessed=(int(f_domain.nbytes)
                        + (int(fg.nbytes) if has_general else 0)
                        + weight_bytes
                        + B * dim_out * jnp.dtype(out_dtype).itemsize))

    def _call(use_buffered):
        def spec(shape, imap, nbuf):
            if use_buffered and hasattr(pl, "Buffered"):
                try:
                    return pl.BlockSpec(shape, imap, pipeline_mode=pl.Buffered(nbuf))
                except TypeError:
                    pass
            return pl.BlockSpec(shape, imap)

        # Constant index_map -> VMEM-resident across all batch tiles; single buffer.
        def wspec(a):
            return spec(a.shape, lambda i: (0, 0), 1)

        if has_general:
            kernel = functools.partial(_gnu_kernel_general, gamma=gamma, dim_out=dim_out)
            in_specs = [
                spec((tb, d_dom), lambda i: (i, 0), 3),
                spec((tb, d_gen), lambda i: (i, 0), 3),
                wspec(w1), wspec(b1), wspec(w2), wspec(b2),
            ]
            operands = (f_domain, fg, w1, b1, w2, b2)
        else:
            kernel = functools.partial(_gnu_kernel_domain_only, gamma=gamma, dim_out=dim_out)
            in_specs = [
                spec((tb, d_dom), lambda i: (i, 0), 3),
                wspec(w1), wspec(b1), wspec(w2), wspec(b2),
            ]
            operands = (f_domain, w1, b1, w2, b2)

        return pl.pallas_call(
            kernel,
            out_shape=jax.ShapeDtypeStruct((B, dim_out), out_dtype),
            grid=grid,
            in_specs=in_specs,
            out_specs=spec((tb, dim_out), lambda i: (i, 0), 3),
            compiler_params=pltpu.CompilerParams(
                dimension_semantics=("parallel",),        # megacore-shardable on v7x
                vmem_limit_bytes=vmem_limit),
            cost_estimate=cost,
        )(*operands)

    try:
        return _call(True)
    except Exception:
        # pipeline_mode / pl.Buffered unsupported by this jax/libtpu -> default buffering.
        return _call(False)


# --------------------------------------------------------------------------- #
# Init + pure-JAX reference
# --------------------------------------------------------------------------- #
def init_params(key, dim_in, dim_hidden, dim_out, dtype=jnp.float32):
    """Synthetic init matching nn.Linear shapes (weights pre-transposed [in, out])."""
    k1, k2, k3, k4 = jax.random.split(key, 4)
    lim1 = 1.0 / jnp.sqrt(dim_in)
    lim2 = 1.0 / jnp.sqrt(dim_hidden)
    w1 = jax.random.uniform(k1, (dim_in, dim_hidden), dtype, -lim1, lim1)
    b1 = jax.random.uniform(k2, (1, dim_hidden), dtype, -lim1, lim1)
    w2 = jax.random.uniform(k3, (dim_hidden, dim_out), dtype, -lim2, lim2)
    b2 = jax.random.uniform(k4, (1, dim_out), dtype, -lim2, lim2)
    return (w1, b1, w2, b2)


def reference(f_domain, params, f_general=None, gamma=2.0):
    if f_general is None:
        x = f_domain
    else:
        x = jnp.concatenate([f_domain, jax.lax.stop_gradient(f_general)], axis=-1)
    w1, b1, w2, b2 = params
    h = jnp.maximum(x @ w1 + b1.reshape(1, -1), 0.0)
    return gamma * jax.nn.sigmoid(h @ w2 + b2.reshape(1, -1))


# --------------------------------------------------------------------------- #
if __name__ == "__main__":
    key = jax.random.PRNGKey(0)
    k_dom, k_gen, k_par, k_par2 = jax.random.split(key, 4)

    batch = 8
    dim_domain = 16
    dim_general = 16
    dim_in = dim_domain + dim_general
    dim_hidden = 32
    dim_out = 32
    gamma = 2.0

    f_domain = jax.random.normal(k_dom, (batch, dim_domain), jnp.float32)
    f_general = jax.random.normal(k_gen, (batch, dim_general), jnp.float32)

    # ---- with general branch ------------------------------------------------
    params = init_params(k_par, dim_in, dim_hidden, dim_out)
    ref = reference(f_domain, params, f_general, gamma=gamma)

    # f32 compute path (numerical check of the kernel math)
    prep_f32 = prepare_params(params, compute_dtype=jnp.float32)
    out_f32 = jax.block_until_ready(
        gate_neural_unit(f_domain, prep_f32, f_general, gamma=gamma))
    assert out_f32.shape == (batch, dim_out) and out_f32.dtype == jnp.float32
    assert jnp.allclose(out_f32, ref, atol=2e-3, rtol=2e-3), "f32 mismatch vs reference"

    # bf16 compute path, f32 output
    prep_bf16 = prepare_params(params, compute_dtype=jnp.bfloat16)
    out_bf16 = jax.block_until_ready(
        gate_neural_unit(f_domain, prep_bf16, f_general, gamma=gamma))
    assert out_bf16.shape == (batch, dim_out)
    assert jnp.allclose(out_bf16.astype(jnp.float32), ref, atol=3e-2, rtol=3e-2), \
        "bf16 mismatch vs reference"

    # production config: bf16 compute + bf16 output (halves writeback bytes)
    out_bf16o = jax.block_until_ready(
        gate_neural_unit(f_domain, prep_bf16, f_general, gamma=gamma,
                         out_dtype=jnp.bfloat16))
    assert out_bf16o.dtype == jnp.bfloat16 and out_bf16o.shape == (batch, dim_out)
    assert jnp.allclose(out_bf16o.astype(jnp.float32), ref, atol=4e-2, rtol=4e-2), \
        "bf16-out mismatch vs reference"

    # ---- domain-only branch (f_general is None) -----------------------------
    params_d = init_params(k_par2, dim_domain, dim_hidden, dim_out)
    ref_d = reference(f_domain, params_d, None, gamma=gamma)
    prep_d = prepare_params(params_d, compute_dtype=jnp.float32)
    out_d = jax.block_until_ready(
        gate_neural_unit(f_domain, prep_d, None, gamma=gamma))
    assert out_d.shape == (batch, dim_out)
    assert jnp.allclose(out_d, ref_d, atol=2e-3, rtol=2e-3), "domain-only mismatch"

    print("KERNEL_OK")
</pallas_src>

<mosaic_0001>
module attributes {stable_mosaic.version = 11 : i64} {
  func.func @_gnu_kernel_general(%arg0: i32, %arg1: memref<8x16xf32, #tpu.memory_space<vmem>>, %arg2: memref<8x16xf32, #tpu.memory_space<vmem>>, %arg3: memref<32x128xf32, #tpu.memory_space<vmem>>, %arg4: memref<1x128xf32, #tpu.memory_space<vmem>>, %arg5: memref<128x128xf32, #tpu.memory_space<vmem>>, %arg6: memref<1x32xf32, #tpu.memory_space<vmem>>, %arg7: memref<8x32xf32, #tpu.memory_space<vmem>>) attributes {dimension_semantics = [#tpu.dimension_semantics<parallel>], iteration_bounds = array<i64: 1>, scalar_prefetch = 0 : i64, scratch_operands = 0 : i64, tpu.core_type = #tpu.core_type<tc>, window_params = [{transform_indices = @transform_0, window_bounds = array<i64: 8, 16>}, {transform_indices = @transform_1, window_bounds = array<i64: 8, 16>}, {pipeline_mode = #tpu.pipeline_mode<synchronous>, transform_indices = @transform_2, window_bounds = array<i64: 32, 128>}, {pipeline_mode = #tpu.pipeline_mode<synchronous>, transform_indices = @transform_3, window_bounds = array<i64: 1, 128>}, {pipeline_mode = #tpu.pipeline_mode<synchronous>, transform_indices = @transform_4, window_bounds = array<i64: 128, 128>}, {pipeline_mode = #tpu.pipeline_mode<synchronous>, transform_indices = @transform_5, window_bounds = array<i64: 1, 32>}, {transform_indices = @transform_6, window_bounds = array<i64: 8, 32>}]} {
    %c0 = arith.constant 0 : index
    %c0_0 = arith.constant 0 : index
    %0 = vector.load %arg1[%c0, %c0_0] : memref<8x16xf32, #tpu.memory_space<vmem>>, vector<8x16xf32>
    %c0_1 = arith.constant 0 : index
    %c0_2 = arith.constant 0 : index
    %1 = vector.load %arg2[%c0_1, %c0_2] : memref<8x16xf32, #tpu.memory_space<vmem>>, vector<8x16xf32>
    %2 = tpu.concatenate %0, %1 in 1 : vector<8x16xf32>, vector<8x16xf32> -> vector<8x32xf32>
    %c0_3 = arith.constant 0 : index
    %c0_4 = arith.constant 0 : index
    %3 = vector.load %arg3[%c0_3, %c0_4] : memref<32x128xf32, #tpu.memory_space<vmem>>, vector<32x128xf32>
    %cst = arith.constant dense<0.000000e+00> : vector<8x128xf32>
    %4 = tpu.matmul %2, %3, %cst {dimension_numbers = #tpu.dot_dimension_numbers<[1], [0], [0], [1], [0, 0, 1, 1], [], []>} : vector<8x32xf32>, vector<32x128xf32>, vector<8x128xf32> -> vector<8x128xf32>
    %c0_5 = arith.constant 0 : index
    %c0_6 = arith.constant 0 : index
    %5 = vector.load %arg4[%c0_5, %c0_6] : memref<1x128xf32, #tpu.memory_space<vmem>>, vector<1x128xf32>
    %6 = vector.broadcast %5 : vector<1x128xf32> to vector<8x128xf32>
    %7 = arith.addf %4, %6 : vector<8x128xf32>
    %cst_7 = arith.constant 0.000000e+00 : f32
    %8 = vector.broadcast %cst_7 : f32 to vector<8x128xf32>
    %9 = arith.maximumf %7, %8 : vector<8x128xf32>
    %c0_8 = arith.constant 0 : index
    %c0_9 = arith.constant 0 : index
    %10 = vector.load %arg5[%c0_8, %c0_9] : memref<128x128xf32, #tpu.memory_space<vmem>>, vector<128x128xf32>
    %cst_10 = arith.constant dense<0.000000e+00> : vector<8x128xf32>
    %11 = tpu.matmul %9, %10, %cst_10 {dimension_numbers = #tpu.dot_dimension_numbers<[1], [0], [0], [1], [0, 0, 1, 1], [], []>} : vector<8x128xf32>, vector<128x128xf32>, vector<8x128xf32> -> vector<8x128xf32>
    %12 = vector.extract_strided_slice %11 {offsets = [0, 0], sizes = [8, 32], strides = [1, 1]} : vector<8x128xf32> to vector<8x32xf32>
    %c0_11 = arith.constant 0 : index
    %c0_12 = arith.constant 0 : index
    %13 = vector.load %arg6[%c0_11, %c0_12] : memref<1x32xf32, #tpu.memory_space<vmem>>, vector<1x32xf32>
    %14 = vector.broadcast %13 : vector<1x32xf32> to vector<8x32xf32>
    %15 = arith.addf %12, %14 : vector<8x32xf32>
    %16 = arith.negf %15 : vector<8x32xf32>
    %17 = math.exp %16 : vector<8x32xf32>
    %cst_13 = arith.constant 1.000000e+00 : f32
    %18 = vector.broadcast %cst_13 : f32 to vector<8x32xf32>
    %19 = arith.addf %18, %17 : vector<8x32xf32>
    %20 = arith.divf %18, %19 : vector<8x32xf32>
    %cst_14 = arith.constant 2.000000e+00 : f32
    %21 = vector.broadcast %cst_14 : f32 to vector<8x32xf32>
    %22 = arith.mulf %21, %20 : vector<8x32xf32>
    %c0_15 = arith.constant 0 : index
    %c0_16 = arith.constant 0 : index
    %23 = vector.load %arg7[%c0_15, %c0_16] : memref<8x32xf32, #tpu.memory_space<vmem>>, vector<8x32xf32>
    tpu.vector_store %arg7[%c0_15, %c0_16], %22 {strides = array<i32>} : memref<8x32xf32, #tpu.memory_space<vmem>>, vector<8x32xf32>,
    return
  }
  func.func @transform_0(%arg0: i32) -> (i32, i32) {
    %c0_i32 = arith.constant 0 : i32
    %c0_i32_0 = arith.constant 0 : i32
    return %arg0, %c0_i32 : i32, i32
  }
  func.func @transform_1(%arg0: i32) -> (i32, i32) {
    %c0_i32 = arith.constant 0 : i32
    %c0_i32_0 = arith.constant 0 : i32
    return %arg0, %c0_i32 : i32, i32
  }
  func.func @transform_2(%arg0: i32) -> (i32, i32) {
    %c0_i32 = arith.constant 0 : i32
    %c0_i32_0 = arith.constant 0 : i32
    %c0_i32_1 = arith.constant 0 : i32
    return %c0_i32, %c0_i32_0 : i32, i32
  }
  func.func @transform_3(%arg0: i32) -> (i32, i32) {
    %c0_i32 = arith.constant 0 : i32
    %c0_i32_0 = arith.constant 0 : i32
    %c0_i32_1 = arith.constant 0 : i32
    return %c0_i32, %c0_i32_0 : i32, i32
  }
  func.func @transform_4(%arg0: i32) -> (i32, i32) {
    %c0_i32 = arith.constant 0 : i32
    %c0_i32_0 = arith.constant 0 : i32
    %c0_i32_1 = arith.constant 0 : i32
    return %c0_i32, %c0_i32_0 : i32, i32
  }
  func.func @transform_5(%arg0: i32) -> (i32, i32) {
    %c0_i32 = arith.constant 0 : i32
    %c0_i32_0 = arith.constant 0 : i32
    %c0_i32_1 = arith.constant 0 : i32
    return %c0_i32, %c0_i32_0 : i32, i32
  }
  func.func @transform_6(%arg0: i32) -> (i32, i32) {
    %c0_i32 = arith.constant 0 : i32
    %c0_i32_0 = arith.constant 0 : i32
    return %arg0, %c0_i32 : i32, i32
  }
}

</mosaic_0001>

<bundles_post_ra>
// kernel: tpu_custom_call.1
= control target key start
LH: loop header
LB: loop body
LE: loop exit
PB: predicated region body
PF: predicated region fallthrough
CT: control target
= control target key end

     0   :  { %11 = vsyncpa [#allocation3], 0  ;;  %s736_s0 = inlined_call_operand.hbm [shape: f32[8,16], index: 0, kind: input, shape index: {}]   ;;  %s737_s1 = inlined_call_operand.hbm [shape: f32[8,16], index: 1, kind: input, shape index: {}]   ;;  %s738_s2 = inlined_call_operand.hbm [shape: f32[32,128], index: 2, kind: input, shape index: {}]   ;;  %s739_s3 = inlined_call_operand.hbm [shape: f32[1,128], index: 3, kind: input, shape index: {}]   ;;  %s740_s4 = inlined_call_operand.hbm [shape: f32[128,128], index: 4, kind: input, shape index: {}]   ;;  %s741_s5 = inlined_call_operand.hbm [shape: f32[1,32], index: 5, kind: input, shape index: {}]   ;;  %s742_s6 = inlined_call_operand.hbm [shape: f32[8,32], index: 6, kind: output, shape index: {}]  }
   0x1   :  { %12 = vsyncpa [#allocation6], 0 }
   0x2   :  { %13 = vsyncpa [#allocation9], 0 }
   0x3   :  { %14 = vsyncpa [#allocation12], 0 }
   0x4   :  { %15 = vsyncpa [#allocation4], 0  ;;  %s595_s21 = smov [#allocation5]   ;;  %s596_s23 = smov [#allocation8]  }
   0x5   :  { %s32_s22 = sshll.u32 %s595_s21, 4  ;;  %s54_s24 = sshll.u32 %s596_s23, 4  ;;  %s33_s22 = int_to_ptr.vmem [resolvable:$true] %s32_s22  ;;  %s55_s24 = int_to_ptr.vmem [resolvable:$true] %s54_s24 }
   0x6   :  { %s431_s27 = scalar_lea.hbm %s737_s1, 128 }
   0x7   :  { %p432_p0 = scmp.ne.s32.totalorder %s737_s1, %s431_s27  ;;  %p435_p1 = scmp.lt.u32.totalorder %s431_s27, %s737_s1 }
   0x9   :  { %p437_p2 = pnand %p435_p1, %p432_p0 }
   0xb   :  { %440 = shalt.err (!%p437_p2)
}
   0xc   :  { %s441_s8 = scalar_lea.vmem %s33_s22, 128  ;;  %p446_p4 = scmp.lt.s32.totalorder %s33_s22, %s33_s22 }
   0xd   :  { %p442_p3 = scmp.ne.s32.totalorder %s33_s22, %s441_s8  ;;  %p447_p5 = scmp.lt.s32.totalorder %s441_s8, %s441_s8 }
   0xf   :  { %p448_p6 = por %p447_p5, %p446_p4 }
  0x11   :  { %p449_p7 = pnand %p448_p6, %p442_p3 }
  0x13   :  { %452 = shalt.err (!%p449_p7)
}
  0x14   :  { %35 = dma.hbm_to_vmem [thread:$0]  %s737_s1, 128, %s33_s22, [#allocation6]  }
  0x15   :  { %s453_s13 = scalar_lea.hbm %s739_s3, 16 }
  0x16   :  { %p454_p8 = scmp.ne.s32.totalorder %s739_s3, %s453_s13  ;;  %p457_p9 = scmp.lt.u32.totalorder %s453_s13, %s739_s3 }
  0x18   :  { %p459_p10 = pnand %p457_p9, %p454_p8 }
  0x1a   :  { %462 = shalt.err (!%p459_p10)
}
  0x1b   :  { %s463_s18 = scalar_lea.vmem %s55_s24, 16  ;;  %s467_s19 = scalar_lea.vmem %s55_s24, 32 }
  0x1c   :  { %p464_p11 = scmp.ne.s32.totalorder %s55_s24, %s463_s18  ;;  %p468_p12 = scmp.lt.s32.totalorder %s55_s24, %s55_s24 }
  0x1d   :  { %p469_p13 = scmp.lt.s32.totalorder %s467_s19, %s463_s18 }
  0x1f   :  { %p470_p0 = por %p469_p13, %p468_p12 }
  0x21   :  { %p471_p1 = pnand %p470_p0, %p464_p11 }
  0x23   :  { %474 = shalt.err (!%p471_p1)
}
  0x24   :  { %57 = dma.hbm_to_vmem [thread:$0]  %s739_s3, 16, %s55_s24, [#allocation9]  }
  0x25   :  { %s597_s21 = smov [#allocation2]   ;;  %s598_s23 = smov [#allocation7]  }
  0x26   :  { %s22_s22 = sshll.u32 %s597_s21, 4  ;;  %s41_s25 = sshll.u32 %s598_s23, 4  ;;  %s23_s22 = int_to_ptr.vmem [resolvable:$true] %s22_s22  ;;  %s667_s25 = int_to_ptr.vmem [resolvable:$true] %s41_s25 }
  0x27   :  { %s475_s28 = scalar_lea.hbm %s736_s0, 128 }
  0x28   :  { %p476_p2 = scmp.ne.s32.totalorder %s736_s0, %s475_s28  ;;  %p479_p3 = scmp.lt.u32.totalorder %s475_s28, %s736_s0 }
  0x2a   :  { %p481_p4 = pnand %p479_p3, %p476_p2 }
  0x2c   :  { %484 = shalt.err (!%p481_p4)
}
  0x2d   :  { %s485_s3 = scalar_lea.vmem %s23_s22, 128  ;;  %p490_p6 = scmp.lt.s32.totalorder %s23_s22, %s23_s22 }
  0x2e   :  { %p486_p5 = scmp.ne.s32.totalorder %s23_s22, %s485_s3  ;;  %p491_p7 = scmp.lt.s32.totalorder %s485_s3, %s485_s3 }
  0x30   :  { %p492_p8 = por %p491_p7, %p490_p6 }
  0x32   :  { %p493_p9 = pnand %p492_p8, %p486_p5 }
  0x34   :  { %496 = shalt.err (!%p493_p9)
}
  0x35   :  { %25 = dma.hbm_to_vmem [thread:$0]  %s736_s0, 128, %s23_s22, [#allocation3]  }
  0x36   :  { %s497_s12 = scalar_lea.hbm %s738_s2, 512 }
  0x37   :  { %p498_p10 = scmp.ne.s32.totalorder %s738_s2, %s497_s12  ;;  %p501_p11 = scmp.lt.u32.totalorder %s497_s12, %s738_s2 }
  0x39   :  { %p503_p12 = pnand %p501_p11, %p498_p10 }
  0x3b   :  { %506 = shalt.err (!%p503_p12)
}
  0x3c   :  { %s507_s17 = scalar_lea.vmem %s667_s25, 512  ;;  %p512_p0 = scmp.lt.s32.totalorder %s667_s25, %s667_s25 }
  0x3d   :  { %p508_p13 = scmp.ne.s32.totalorder %s667_s25, %s507_s17  ;;  %p513_p1 = scmp.lt.s32.totalorder %s507_s17, %s507_s17 }
  0x3f   :  { %p514_p2 = por %p513_p1, %p512_p0 }
  0x41   :  { %p515_p3 = pnand %p514_p2, %p508_p13 }
  0x43   :  { %518 = shalt.err (!%p515_p3)
}
  0x44   :  { %s599_s0 = smov 128   ;;  %s600_s18 = smov 8  }
  0x45   :  { %47 = dma.hbm_to_vmem [thread:$0]  %s738_s2, 512, %s667_s25, [#allocation6], %s599_s0, %s599_s0, %s600_s18  }
  0x46   :  { %s601_s20 = smov [#allocation10]   ;;  %s602_s22 = smov [#allocation11]  }
  0x47   :  { %s63_s21 = sshll.u32 %s601_s20, 4  ;;  %s76_s23 = sshll.u32 %s602_s22, 4  ;;  %s64_s21 = int_to_ptr.vmem [resolvable:$true] %s63_s21  ;;  %s77_s23 = int_to_ptr.vmem [resolvable:$true] %s76_s23 }
  0x48   :  { %s519_s28 = scalar_lea.hbm %s740_s4, 2048 }
  0x49   :  { %p520_p4 = scmp.ne.s32.totalorder %s740_s4, %s519_s28  ;;  %p523_p5 = scmp.lt.u32.totalorder %s519_s28, %s740_s4 }
  0x4b   :  { %p525_p6 = pnand %p523_p5, %p520_p4 }
  0x4d   :  { %528 = shalt.err (!%p525_p6)
}
  0x4e   :  { %s529_s2 = scalar_lea.vmem %s64_s21, 2048  ;;  %p534_p8 = scmp.lt.s32.totalorder %s64_s21, %s64_s21 }
  0x4f   :  { %p530_p7 = scmp.ne.s32.totalorder %s64_s21, %s529_s2  ;;  %p535_p9 = scmp.lt.s32.totalorder %s529_s2, %s529_s2 }
  0x51   :  { %p536_p10 = por %p535_p9, %p534_p8 }
  0x53   :  { %p537_p11 = pnand %p536_p10, %p530_p7 }
  0x55   :  { %540 = shalt.err (!%p537_p11)
}
  0x56   :  { %69 = dma.hbm_to_vmem [thread:$0]  %s740_s4, 2048, %s64_s21, [#allocation9], %s599_s0, %s599_s0, %s600_s18  }
  0x57   :  { %s541_s10 = scalar_lea.hbm %s741_s5, 16 }
  0x58   :  { %p542_p12 = scmp.ne.s32.totalorder %s741_s5, %s541_s10  ;;  %p545_p13 = scmp.lt.u32.totalorder %s541_s10, %s741_s5 }
  0x5a   :  { %p547_p0 = pnand %p545_p13, %p542_p12 }
  0x5c   :  { %550 = shalt.err (!%p547_p0)
}
  0x5d   :  { %s551_s15 = scalar_lea.vmem %s77_s23, 16  ;;  %s555_s16 = scalar_lea.vmem %s77_s23, 32 }
  0x5e   :  { %p552_p1 = scmp.ne.s32.totalorder %s77_s23, %s551_s15  ;;  %p556_p2 = scmp.lt.s32.totalorder %s77_s23, %s77_s23 }
  0x5f   :  { %p557_p3 = scmp.lt.s32.totalorder %s555_s16, %s551_s15 }
  0x61   :  { %p558_p4 = por %p557_p3, %p556_p2 }
  0x63   :  { %p559_p5 = pnand %p558_p4, %p552_p1 }
  0x65   :  { %562 = shalt.err (!%p559_p5)
}
  0x66   :  { %79 = dma.hbm_to_vmem [thread:$0]  %s741_s5, 16, %s77_s23, [#allocation12]  }
  0x67   :  { %585 = dma.done.wait [#allocation3], 128  }
  0x68   :  { %586 = vsyncadd [#allocation3], 4294967168 }
  0x69   :  { %587 = dma.done.wait [#allocation6], 640  }
  0x6a   :  { %588 = vsyncadd [#allocation6], 4294966656 }
  0x6b   :  { %589 = dma.done.wait [#allocation9], 2064  }
  0x6c   :  { %590 = vsyncadd [#allocation9], 4294965232 }
  0x6d   :  { %591 = dma.done.wait [#allocation12], 16  }
  0x6e   :  { %592 = vsyncadd [#allocation12], 4294967280  ;;  %v603_v0 = vmov 0.0|0.0   ;;  %vm604_vm0 = vmmov 0   ;;  %v605_v1 = vmov 0.0   ;;  %v99_v2 = vld [vmem:[#allocation5] sm:$0xff] }
  0x6f   :  { %384 = vmatprep.subr.bf16.mxu0 %v603_v0  ;;  %390 = vmatprep.subr.bf16.mxu1 %v603_v0  ;;  %v106_v3 = vld [vmem:[#allocation7] sm:$0xff]  ;;  %v107_v4 = vld [vmem:[#allocation7 + $0x8] sm:$0xff]  ;;  %s606_s0 = smov 16   ;;  %v108_v6 = vld [vmem:[#allocation7 + $0x10] sm:$0xff]  ;;  %vm104_vm1 = vcmask 130048   ;;  %vm117_vm2 = vcmask 261120  }
  0x70   :  { %346 = vmatprep.mubr.msk.f32.mxu0 %vm604_vm0, %v605_v1  ;;  %381 = vmatprep.mubr.msk.f32.mxu1 %vm604_vm0, %v605_v1  ;;  %v385_v5 = vpack.c.bf16 %v107_v4, %v106_v3  ;;  %v109_v7 = vld [vmem:[#allocation7 + $0x18] sm:$0xff]  ;;  %v192_v8 = vld [vmem:[#allocation10] sm:$0xff]  ;;  %v193_v9 = vld [vmem:[#allocation10 + $0x8] sm:$0xff]  ;;  %s607_s5 = smov [#allocation13]  }
  0x71   :  { %101 = vrot.lane.b32.xlu0 %v99_v2, %s606_s0  ;;  %v194_v10 = vld [vmem:[#allocation10 + $0x10] sm:$0xff]  ;;  %v388_v11 = vpack.c.bf16 %v109_v7, %v108_v6  ;;  %v391_v12 = vpack.c.bf16 %v193_v9, %v192_v8  ;;  %v195_v13 = vld [vmem:[#allocation10 + $0x18] sm:$0xff]  ;;  %v196_v15 = vld [vmem:[#allocation10 + $0x20] sm:$0xff]  ;;  %s300_s18 = sshll.u32 %s607_s5, 4  ;;  %s301_s18 = int_to_ptr.vmem [resolvable:$true] %s300_s18 }
  0x72   :  { %386 = vmatpush3.bf16.msra.mxu0 %v385_v5  ;;  %v394_v14 = vpack.c.bf16 %v195_v13, %v194_v10  ;;  %v197_v16 = vld [vmem:[#allocation10 + $0x28] sm:$0xff]  ;;  %v198_v18 = vld [vmem:[#allocation10 + $0x30] sm:$0xff]  ;;  %v199_v19 = vld [vmem:[#allocation10 + $0x38] sm:$0xff]  ;;  %s563_s19 = scalar_lea.vmem %s301_s18, 128  ;;  %p568_p7 = scmp.lt.s32.totalorder %s301_s18, %s301_s18 }
  0x73   :  { %387 = vmatprep.subr.bf16.mxu0 %v603_v0  ;;  %392 = vmatpush3.bf16.msra.mxu1 %v391_v12  ;;  %v397_v17 = vpack.c.bf16 %v197_v16, %v196_v15  ;;  %v400_v20 = vpack.c.bf16 %v199_v19, %v198_v18  ;;  %v200_v21 = vld [vmem:[#allocation10 + $0x40] sm:$0xff]  ;;  %v201_v22 = vld [vmem:[#allocation10 + $0x48] sm:$0xff]  ;;  %v202_v24 = vld [vmem:[#allocation10 + $0x50] sm:$0xff]  ;;  %p564_p6 = scmp.ne.s32.totalorder %s301_s18, %s563_s19  ;;  %p569_p8 = scmp.lt.s32.totalorder %s563_s19, %s563_s19 }
  0x74   :  { %393 = vmatprep.subr.bf16.mxu1 %v603_v0  ;;  %v403_v23 = vpack.c.bf16 %v201_v22, %v200_v21  ;;  %v203_v25 = vld [vmem:[#allocation10 + $0x58] sm:$0xff]  ;;  %v204_v27 = vld [vmem:[#allocation10 + $0x60] sm:$0xff]  ;;  %v205_v28 = vld [vmem:[#allocation10 + $0x68] sm:$0xff] }
  0x75   :  { %v406_v26 = vpack.c.bf16 %v203_v25, %v202_v24  ;;  %v409_v29 = vpack.c.bf16 %v205_v28, %v204_v27  ;;  %v98_v30 = vld [vmem:[#allocation2] sm:$0xff]  ;;  %v207_v34 = vld [vmem:[#allocation10 + $0x78] sm:$0xff]  ;;  %v314_v41 = vld [vmem:[#allocation11] ss:$0 sm:$0xff]  ;;  %p570_p9 = por %p569_p8, %p568_p7 }
  0x76   :  { %389 = vmatpush3.bf16.msra.mxu0 %v388_v11  ;;  %v206_v33 = vld [vmem:[#allocation10 + $0x70] sm:$0xff]  ;;  %v312_v36 = vld [vmem:[#allocation8] ss:$0 sm:$0xff] }
  0x77   :  { %395 = vmatpush3.bf16.msra.mxu1 %v394_v14  ;;  %v412_v35 = vpack.c.bf16 %v207_v34, %v206_v33  ;;  %p571_p10 = pnand %p570_p9, %p564_p6 }
  0x78   :  { %396 = vmatprep.subr.bf16.mxu1 %v603_v0 }
  0x7b   :  { %398 = vmatpush3.bf16.msra.mxu1 %v397_v17 }
  0x7c   :  { %399 = vmatprep.subr.bf16.mxu1 %v603_v0 }
  0x7f   :  { %401 = vmatpush3.bf16.msra.mxu1 %v400_v20 }
  0x80   :  { %402 = vmatprep.subr.bf16.mxu1 %v603_v0 }
  0x83   :  { %404 = vmatpush3.bf16.msra.mxu1 %v403_v23 }
  0x84   :  { %405 = vmatprep.subr.bf16.mxu1 %v603_v0 }
  0x87   :  { %407 = vmatpush3.bf16.msra.mxu1 %v406_v26 }
  0x88   :  { %408 = vmatprep.subr.bf16.mxu1 %v603_v0 }
  0x8b   :  { %410 = vmatpush3.bf16.msra.mxu1 %v409_v29 }
  0x8c   :  { %411 = vmatprep.subr.bf16.mxu1 %v603_v0 }
  0x8f   :  { %413 = vmatpush3.bf16.msra.mxu1 %v412_v35 }
  0xe3   :  { %v102_v31 = vpop.permute.xlu0 %101 }
  0xe4   :  { %v105_v32 = vsel %vm104_vm1, %v98_v30, %v102_v31 }
  0xe5   :  { %347 = vmatmul.mubr.msk.f32.vlgmr.msra.gmra.mrb[0].mxu0 %vm117_vm2, %v105_v32 }
 0x1b8   :  { %v187_v37 = vpop.f32.mrb[0].mxu0 }
 0x1b9   :  { %v188_v38 = vadd.f32 %v312_v36, %v187_v37  ;;  %v348_v39 = vpop.f32.mrb[1].mxu0 }
 0x1bb   :  { %v191_v40 = vmax.f32 %v188_v38, 0.0 }
 0x1bd   :  { %382 = vmatmul.mubr.f32.vlgmr.msra.gmra.mrb[0].mxu1 %v191_v40 }
 0x290   :  { %v274_v42 = vpop.f32.mrb[0].mxu1 }
 0x291   :  { %v285_v43 = vadd.f32 %v314_v41, %v274_v42  ;;  %v383_v44 = vpop.f32.mrb[1].mxu1 }
 0x293   :  { %v315_v45 = vmul.f32 -1.442695, %v285_v43 }
 0x295   :  { %427 = vpow2.f32 %v315_v45 }
 0x29f   :  { %v428_v46 = vpop.eup %427 }
 0x2a0   :  { %v289_v47 = vadd.f32 1.0, %v428_v46 }
 0x2a2   :  { %429 = vrcp.f32 %v289_v47 }
 0x2ac   :  { %v430_v48 = vpop.eup %429 }
 0x2ad   :  { %v292_v49 = vmul.f32 2.0, %v430_v48 }
 0x2af   :  { %293 = vst.msk [vmem:[#allocation13] sm:$0xff] %vm117_vm2, %v292_v49 }
 0x2b0   :  { %574 = shalt.err (!%p571_p10)
}
 0x2b1   :  { %s575_s21 = scalar_lea.hbm %s742_s6, 128 }
 0x2b2   :  { %p576_p11 = scmp.ne.s32.totalorder %s742_s6, %s575_s21  ;;  %p579_p12 = scmp.lt.u32.totalorder %s575_s21, %s742_s6 }
 0x2b4   :  { %p581_p13 = pnand %p579_p12, %p576_p11 }
 0x2b6   :  { %584 = shalt.err (!%p581_p13)
}
 0x2b7   :  { %303 = dma.vmem_to_hbm [thread:$0]  %s301_s18, 128, %s742_s6, [#allocation4]  }
 0x2b8   :  { %593 = dma.done.wait [#allocation4], 128  }
 0x2b9   :  { %594 = vsyncadd [#allocation4], 4294967168 }
 0x2ba   :  { %307 = vsyncpa [#allocation3], 1 }
 0x2bb   :  { %308 = vsyncpa [#allocation6], 1 }
 0x2bc   :  { %309 = vsyncpa [#allocation9], 1 }
 0x2bd   :  { %310 = vsyncpa [#allocation12], 1 }
 0x2be   :  { %311 = vsyncpa [#allocation4], 1 }

</bundles_post_ra>
